<compile_context>
chip_gen: v6e
topology: v6e:2x2x1
jax: 0.10.0
libtpu: 0.0.40
codegen_flags: <defaults>
</compile_context>

<pallas_src>
import functools

import jax
import jax.numpy as jnp
from jax.experimental import pallas as pl
from jax.experimental.pallas import tpu as pltpu


def _round_up(x: int, m: int) -> int:
    return ((x + m - 1) // m) * m


def _pad_lane_dim(d: int) -> int:
    # 128-aligned; 256-aligned once big enough to help fill the 256x256 MXU
    # on v6e/v7x (v5e's 128x128 MXU is fine either way).
    return _round_up(d, 128) if d <= 128 else _round_up(d, 256)


def _pad_batch_dim(b: int, dtype) -> int:
    # Sublane packing: 8 rows per vreg tile for 32-bit, 16 for bf16.
    packing = max(1, 4 // jnp.dtype(dtype).itemsize)
    return _round_up(b, 8 * packing)


def rnn_seq_kernel(hx0_ref, x_ref, w_ref, b_ref, o_ref, h_scratch,
                   *, i_pad, compute_dtype):
    """One recurrent step; grid axis 0 is time.

    hx0_ref:   (B_pad, H_pad) f32        initial hidden state (grid-invariant)
    x_ref:     (1, B_pad, I_pad)         x_t                  (streamed per step)
    w_ref:     (I_pad + H_pad, H_pad)    [W_ih.T ; W_hh.T]    (VMEM-resident)
    b_ref:     (1, H_pad) f32            b_ih + b_hh          (VMEM-resident)
    o_ref:     (1, B_pad, H_pad)         h_t                  (streamed per step)
    h_scratch: (B_pad, H_pad) f32        carried hidden state
    """
    t = pl.program_id(0)

    @pl.when(t == 0)
    def _():
        h_scratch[...] = hx0_ref[...]

    x_t = x_ref[0]                      # (B_pad, I_pad) in compute_dtype
    h_prev = h_scratch[...]             # (B_pad, H_pad) f32

    # Two MXU passes against the statically row-sliced packed weight; both
    # accumulate in f32.
    z = jnp.dot(x_t, w_ref[:i_pad, :], preferred_element_type=jnp.float32)
    z = z + jnp.dot(h_prev.astype(compute_dtype), w_ref[i_pad:, :],
                    preferred_element_type=jnp.float32)

    h_new = jnp.tanh(z + b_ref[...])    # f32 bias + tanh epilogue (v5e-safe)

    h_scratch[...] = h_new
    o_ref[0] = h_new.astype(o_ref.dtype)


def prepare_rnn_cell_params(w_ih, w_hh, b_ih, b_hh, param_dtype=jnp.bfloat16):
    """One-time parameter packing (amortized across timesteps / calls).

    w_ih: (H, I), w_hh: (H, H)  -- PyTorch convention.
    Returns:
      w_packed: (I_pad + H_pad, H_pad) = [W_ih.T ; W_hh.T], zero-padded,
                param_dtype (bf16 default halves weight HBM traffic).
      bias:     (1, H_pad) = b_ih + b_hh, zero-padded, f32.
    """
    hidden, input_size = w_ih.shape
    i_pad = _pad_lane_dim(input_size)
    h_pad = _pad_lane_dim(hidden)

    w_packed = jnp.zeros((i_pad + h_pad, h_pad), param_dtype)
    w_packed = w_packed.at[:input_size, :hidden].set(
        jnp.transpose(w_ih).astype(param_dtype))
    w_packed = w_packed.at[i_pad:i_pad + hidden, :hidden].set(
        jnp.transpose(w_hh).astype(param_dtype))

    bias = jnp.zeros((1, h_pad), jnp.float32)
    bias = bias.at[:, :hidden].set((b_ih + b_hh).astype(jnp.float32))
    return w_packed, bias


@functools.partial(jax.jit, static_argnames=("hidden_size",))
def rnn_forward_seq(x_seq, w_packed, bias, *, hidden_size, hx=None):
    """Runs T RNNCell steps in one pallas_call; returns all hidden states.

    x_seq: (T, batch, input_size).  hx: (batch, hidden_size) or None (zeros).
    Returns h_seq: (T, batch, hidden_size) in x_seq.dtype.
    """
    seq_len, batch, input_size = x_seq.shape
    k_pad, h_pad = w_packed.shape
    i_pad = k_pad - h_pad
    compute_dtype = w_packed.dtype
    out_dtype = x_seq.dtype

    b_pad = _pad_batch_dim(batch, compute_dtype)

    # One padding/cast for the whole sequence (amortized over T steps).
    x_p = jnp.zeros((seq_len, b_pad, i_pad), compute_dtype)
    x_p = x_p.at[:, :batch, :input_size].set(x_seq.astype(compute_dtype))

    hx0 = jnp.zeros((b_pad, h_pad), jnp.float32)
    if hx is not None:
        hx0 = hx0.at[:batch, :hidden_size].set(hx.astype(jnp.float32))

    c_item = jnp.dtype(compute_dtype).itemsize
    o_item = jnp.dtype(out_dtype).itemsize

    # Working set: every block is double-buffered by default (including the
    # grid-invariant hx0 / W / bias blocks; bias occupies an 8-sublane-padded
    # block), plus the persistent f32 h scratch.
    working_set = (
        2 * b_pad * h_pad * 4               # hx0 block
        + 2 * b_pad * i_pad * c_item        # x_t block
        + 2 * k_pad * h_pad * c_item        # resident W_packed
        + 2 * 8 * h_pad * 4                 # bias block
        + 2 * b_pad * h_pad * o_item        # output block
        + b_pad * h_pad * 4                 # h scratch
    )

    try:
        vmem_cap = int(pltpu.get_tpu_info().vmem_capacity_bytes)
    except Exception:
        vmem_cap = 64 * 1024 * 1024         # conservative (v7x per-core)
    vmem_limit = min(int(0.85 * vmem_cap),
                     max(int(1.25 * working_set) + (2 << 20), 32 << 20))

    cost = pl.CostEstimate(
        flops=2 * seq_len * b_pad * k_pad * h_pad,
        transcendentals=seq_len * b_pad * h_pad,
        bytes_accessed=(seq_len * b_pad * i_pad * c_item   # x (streamed)
                        + k_pad * h_pad * c_item           # W (read once)
                        + 8 * h_pad * 4
                        + b_pad * h_pad * 4
                        + seq_len * b_pad * h_pad * o_item),
    )

    kernel = functools.partial(rnn_seq_kernel, i_pad=i_pad,
                               compute_dtype=compute_dtype)

    h_seq_padded = pl.pallas_call(
        kernel,
        out_shape=jax.ShapeDtypeStruct((seq_len, b_pad, h_pad), out_dtype),
        grid=(seq_len,),
        in_specs=[
            pl.BlockSpec((b_pad, h_pad), lambda t: (0, 0)),        # hx0 (resident)
            pl.BlockSpec((1, b_pad, i_pad), lambda t: (t, 0, 0)),  # x_t (streamed)
            pl.BlockSpec((k_pad, h_pad), lambda t: (0, 0)),        # W   (resident)
            pl.BlockSpec((1, h_pad), lambda t: (0, 0)),            # bias (resident)
        ],
        out_specs=pl.BlockSpec((1, b_pad, h_pad), lambda t: (t, 0, 0)),
        scratch_shapes=[pltpu.VMEM((b_pad, h_pad), jnp.float32)],
        compiler_params=pltpu.CompilerParams(
            dimension_semantics=("arbitrary",),   # sequential recurrence over t
            vmem_limit_bytes=vmem_limit,
        ),
        cost_estimate=cost,
    )(hx0, x_p, w_packed, bias)

    # Single unpadding slice for the entire sequence.
    return h_seq_padded[:, :batch, :hidden_size]


def rnn_cell_forward(x, w_packed, bias, hidden_size, hx=None):
    """Single RNNCell step (torch.nn.RNNCell.forward semantics)."""
    h_seq = rnn_forward_seq(x[None], w_packed, bias,
                            hidden_size=hidden_size, hx=hx)
    return h_seq[0]


def _reference_cell(x, w_ih, w_hh, b_ih, b_hh, hx=None):
    if hx is None:
        hx = jnp.zeros((x.shape[0], w_ih.shape[0]), dtype=x.dtype)
    return jnp.tanh(x @ w_ih.T + b_ih + hx @ w_hh.T + b_hh)


def _reference_seq(x_seq, w_ih, w_hh, b_ih, b_hh, hx=None):
    h = hx
    outs = []
    for t in range(x_seq.shape[0]):
        h = _reference_cell(x_seq[t], w_ih, w_hh, b_ih, b_hh, h)
        outs.append(h)
    return jnp.stack(outs)


if __name__ == "__main__":
    batch, input_size, hidden_size, seq_len = 4, 16, 32, 8

    key = jax.random.PRNGKey(0)
    k_x, k_h, k_wih, k_whh, k_bih, k_bhh = jax.random.split(key, 6)

    # Deterministic init mimicking nn.RNNCell: U(-1/sqrt(H), 1/sqrt(H)).
    bound = 1.0 / jnp.sqrt(jnp.float32(hidden_size))
    w_ih = jax.random.uniform(k_wih, (hidden_size, input_size),
                              jnp.float32, -bound, bound)
    w_hh = jax.random.uniform(k_whh, (hidden_size, hidden_size),
                              jnp.float32, -bound, bound)
    b_ih = jax.random.uniform(k_bih, (hidden_size,), jnp.float32, -bound, bound)
    b_hh = jax.random.uniform(k_bhh, (hidden_size,), jnp.float32, -bound, bound)

    x_seq = jax.random.normal(k_x, (seq_len, batch, input_size), jnp.float32)
    hx = jax.random.normal(k_h, (batch, hidden_size), jnp.float32)

    # ---- strict f32 parameter path (1e-5 correctness) ----------------------
    w_f32, bias_f32 = prepare_rnn_cell_params(w_ih, w_hh, b_ih, b_hh,
                                              param_dtype=jnp.float32)

    out = rnn_cell_forward(x_seq[0], w_f32, bias_f32, hidden_size, hx)
    out_none = rnn_cell_forward(x_seq[0], w_f32, bias_f32, hidden_size, None)
    jax.block_until_ready(out)
    jax.block_until_ready(out_none)
    assert out.shape == (batch, hidden_size)
    assert jnp.allclose(out, _reference_cell(x_seq[0], w_ih, w_hh, b_ih, b_hh, hx),
                        atol=1e-5, rtol=1e-5)
    assert jnp.allclose(out_none,
                        _reference_cell(x_seq[0], w_ih, w_hh, b_ih, b_hh, None),
                        atol=1e-5, rtol=1e-5)

    # Time-folded sequence: weights resident in VMEM for all seq_len steps.
    h_seq = rnn_forward_seq(x_seq, w_f32, bias_f32,
                            hidden_size=hidden_size, hx=hx)
    jax.block_until_ready(h_seq)
    ref_seq = _reference_seq(x_seq, w_ih, w_hh, b_ih, b_hh, hx)
    assert h_seq.shape == (seq_len, batch, hidden_size)
    assert jnp.allclose(h_seq, ref_seq, atol=1e-5, rtol=1e-5)

    # ---- default bf16 weight/activation path (f32 MXU accumulation) --------
    w_bf16, bias_b = prepare_rnn_cell_params(w_ih, w_hh, b_ih, b_hh)  # bf16
    h_seq_bf16 = rnn_forward_seq(x_seq, w_bf16, bias_b,
                                 hidden_size=hidden_size, hx=hx)
    jax.block_until_ready(h_seq_bf16)
    assert h_seq_bf16.shape == (seq_len, batch, hidden_size)
    assert jnp.allclose(h_seq_bf16.astype(jnp.float32), ref_seq,
                        atol=3e-2, rtol=3e-2)

    print("KERNEL_OK")
</pallas_src>

<mosaic_0001>
module attributes {stable_mosaic.version = 11 : i64} {
  func.func @rnn_seq_kernel(%arg0: i32, %arg1: memref<8x128xf32, #tpu.memory_space<vmem>>, %arg2: memref<1x8x128xf32, #tpu.memory_space<vmem>>, %arg3: memref<256x128xf32, #tpu.memory_space<vmem>>, %arg4: memref<1x128xf32, #tpu.memory_space<vmem>>, %arg5: memref<1x8x128xf32, #tpu.memory_space<vmem>>, %arg6: memref<8x128xf32, #tpu.memory_space<vmem>>) attributes {dimension_semantics = [#tpu.dimension_semantics<arbitrary>], iteration_bounds = array<i64: 1>, scalar_prefetch = 0 : i64, scratch_operands = 1 : i64, tpu.core_type = #tpu.core_type<tc>, window_params = [{pipeline_mode = #tpu.pipeline_mode<synchronous>, transform_indices = @transform_0, window_bounds = array<i64: 8, 128>}, {transform_indices = @transform_1, window_bounds = array<i64: 1, 8, 128>}, {pipeline_mode = #tpu.pipeline_mode<synchronous>, transform_indices = @transform_2, window_bounds = array<i64: 256, 128>}, {pipeline_mode = #tpu.pipeline_mode<synchronous>, transform_indices = @transform_3, window_bounds = array<i64: 1, 128>}, {transform_indices = @transform_4, window_bounds = array<i64: 1, 8, 128>}]} {
    %c0_i32 = arith.constant 0 : i32
    %0 = arith.cmpi eq, %arg0, %c0_i32 : i32
    %1 = arith.extui %0 : i1 to i32
    %c0_i32_0 = arith.constant 0 : i32
    %2 = arith.cmpi ne, %1, %c0_i32_0 : i32
    scf.if %2 {
      %c0_16 = arith.constant 0 : index
      %c0_17 = arith.constant 0 : index
      %19 = vector.load %arg1[%c0_16, %c0_17] : memref<8x128xf32, #tpu.memory_space<vmem>>, vector<8x128xf32>
      %c0_18 = arith.constant 0 : index
      %c0_19 = arith.constant 0 : index
      %20 = vector.load %arg6[%c0_18, %c0_19] : memref<8x128xf32, #tpu.memory_space<vmem>>, vector<8x128xf32>
      tpu.vector_store %arg6[%c0_18, %c0_19], %19 {strides = array<i32>} : memref<8x128xf32, #tpu.memory_space<vmem>>, vector<8x128xf32>,
    } else {
    }
    %c0 = arith.constant 0 : index
    %c0_1 = arith.constant 0 : index
    %c0_2 = arith.constant 0 : index
    %3 = vector.load %arg2[%c0, %c0_1, %c0_2] : memref<1x8x128xf32, #tpu.memory_space<vmem>>, vector<1x8x128xf32>
    %4 = vector.shape_cast %3 : vector<1x8x128xf32> to vector<8x128xf32>
    %c0_3 = arith.constant 0 : index
    %c0_4 = arith.constant 0 : index
    %5 = vector.load %arg6[%c0_3, %c0_4] : memref<8x128xf32, #tpu.memory_space<vmem>>, vector<8x128xf32>
    %c0_5 = arith.constant 0 : index
    %c0_6 = arith.constant 0 : index
    %6 = vector.load %arg3[%c0_5, %c0_6] : memref<256x128xf32, #tpu.memory_space<vmem>>, vector<128x128xf32>
    %cst = arith.constant dense<0.000000e+00> : vector<8x128xf32>
    %7 = tpu.matmul %4, %6, %cst {dimension_numbers = #tpu.dot_dimension_numbers<[1], [0], [0], [1], [0, 0, 1, 1], [], []>} : vector<8x128xf32>, vector<128x128xf32>, vector<8x128xf32> -> vector<8x128xf32>
    %c128 = arith.constant 128 : index
    %c0_7 = arith.constant 0 : index
    %8 = vector.load %arg3[%c128, %c0_7] : memref<256x128xf32, #tpu.memory_space<vmem>>, vector<128x128xf32>
    %cst_8 = arith.constant dense<0.000000e+00> : vector<8x128xf32>
    %9 = tpu.matmul %5, %8, %cst_8 {dimension_numbers = #tpu.dot_dimension_numbers<[1], [0], [0], [1], [0, 0, 1, 1], [], []>} : vector<8x128xf32>, vector<128x128xf32>, vector<8x128xf32> -> vector<8x128xf32>
    %10 = arith.addf %7, %9 : vector<8x128xf32>
    %c0_9 = arith.constant 0 : index
    %c0_10 = arith.constant 0 : index
    %11 = vector.load %arg4[%c0_9, %c0_10] : memref<1x128xf32, #tpu.memory_space<vmem>>, vector<1x128xf32>
    %12 = vector.broadcast %11 : vector<1x128xf32> to vector<8x128xf32>
    %13 = arith.addf %10, %12 : vector<8x128xf32>
    %14 = math.tanh %13 : vector<8x128xf32>
    %c0_11 = arith.constant 0 : index
    %c0_12 = arith.constant 0 : index
    %15 = vector.load %arg6[%c0_11, %c0_12] : memref<8x128xf32, #tpu.memory_space<vmem>>, vector<8x128xf32>
    tpu.vector_store %arg6[%c0_11, %c0_12], %14 {strides = array<i32>} : memref<8x128xf32, #tpu.memory_space<vmem>>, vector<8x128xf32>,
    %c0_13 = arith.constant 0 : index
    %c0_14 = arith.constant 0 : index
    %c0_15 = arith.constant 0 : index
    %16 = vector.load %arg5[%c0_13, %c0_14, %c0_15] : memref<1x8x128xf32, #tpu.memory_space<vmem>>, vector<1x8x128xf32>
    %17 = vector.shape_cast %16 : vector<1x8x128xf32> to vector<8x128xf32>
    %18 = vector.shape_cast %14 : vector<8x128xf32> to vector<1x8x128xf32>
    tpu.vector_store %arg5[%c0_13, %c0_14, %c0_15], %18 {strides = array<i32>} : memref<1x8x128xf32, #tpu.memory_space<vmem>>, vector<1x8x128xf32>,
    return
  }
  func.func @transform_0(%arg0: i32) -> (i32, i32) {
    %c0_i32 = arith.constant 0 : i32
    %c0_i32_0 = arith.constant 0 : i32
    %c0_i32_1 = arith.constant 0 : i32
    return %c0_i32, %c0_i32_0 : i32, i32
  }
  func.func @transform_1(%arg0: i32) -> (i32, i32, i32) {
    %c0_i32 = arith.constant 0 : i32
    %c0_i32_0 = arith.constant 0 : i32
    %c0_i32_1 = arith.constant 0 : i32
    return %arg0, %c0_i32, %c0_i32_0 : i32, i32, i32
  }
  func.func @transform_2(%arg0: i32) -> (i32, i32) {
    %c0_i32 = arith.constant 0 : i32
    %c0_i32_0 = arith.constant 0 : i32
    %c0_i32_1 = arith.constant 0 : i32
    return %c0_i32, %c0_i32_0 : i32, i32
  }
  func.func @transform_3(%arg0: i32) -> (i32, i32) {
    %c0_i32 = arith.constant 0 : i32
    %c0_i32_0 = arith.constant 0 : i32
    %c0_i32_1 = arith.constant 0 : i32
    return %c0_i32, %c0_i32_0 : i32, i32
  }
  func.func @transform_4(%arg0: i32) -> (i32, i32, i32) {
    %c0_i32 = arith.constant 0 : i32
    %c0_i32_0 = arith.constant 0 : i32
    %c0_i32_1 = arith.constant 0 : i32
    return %arg0, %c0_i32, %c0_i32_0 : i32, i32, i32
  }
}

</mosaic_0001>

<bundles_post_ra>
// kernel: rnn_forward_seq.1
= control target key start
LH: loop header
LB: loop body
LE: loop exit
PB: predicated region body
PF: predicated region fallthrough
CT: control target
= control target key end

     0   :  { %9 = vsyncpa [#allocation4], 0  ;;  %s361_s15 = smov [#allocation3]   ;;  %s440_s0 = inlined_call_operand.vmem [shape: f32[8,128], index: 0, kind: input, shape index: {}]   ;;  %s441_s1 = inlined_call_operand.vmem [shape: f32[1,8,128], index: 1, kind: input, shape index: {}]   ;;  %s442_s2 = inlined_call_operand.hbm [shape: f32[256,128], index: 2, kind: input, shape index: {}]   ;;  %s443_s3 = inlined_call_operand.vmem [shape: f32[1,128], index: 3, kind: input, shape index: {}]   ;;  %s444_s4 = inlined_call_operand.vmem [shape: f32[1,8,128], index: 4, kind: output, shape index: {}]  }
   0x1   :  { %s19_s16 = sshll.u32 %s361_s15, 4  ;;  %s20_s16 = int_to_ptr.vmem [resolvable:$true] %s19_s16 }
   0x2   :  { %s347_s17 = scalar_lea.vmem %s20_s16, 4096  ;;  %p352_p1 = scmp.lt.s32.totalorder %s20_s16, %s20_s16 }
   0x3   :  { %p348_p0 = scmp.ne.s32.totalorder %s20_s16, %s347_s17  ;;  %p353_p2 = scmp.lt.s32.totalorder %s347_s17, %s347_s17 }
   0x5   :  { %p354_p3 = por %p353_p2, %p352_p1 }
   0x7   :  { %p355_p4 = pnand %p354_p3, %p348_p0 }
   0x9   :  { %358 = shalt.err (!%p355_p4)
}
   0xa   :  { %s362_s18 = smov 128   ;;  %s363_s19 = smov 8  }
   0xb   :  { %25 = dma.hbm_to_vmem [thread:$0]  %s442_s2, 4096, %s20_s16, [#allocation4], %s362_s18, %s362_s18, %s363_s19  }
   0xc   :  { %359 = dma.done.wait [#allocation4], 4096  }
   0xd   :  { %360 = vsyncadd [#allocation4], 4294963200  ;;  %v364_v0 = vmov 0.0   ;;  %vm365_vm0 = vmmov 0   ;;  %v70_v1 = vld [vmem:[#allocation3 + $0xf8] sm:$0xff]  ;;  %v69_v3 = vld [vmem:[#allocation3 + $0xf0] sm:$0xff] }
   0xe   :  { %262 = vmatprep.subr.mxu0 %v364_v0  ;;  %297 = vmatprep.subr.mxu1 %v364_v0  ;;  %v54_v2 = vld [vmem:[#allocation3 + $0x78] sm:$0xff]  ;;  %v53_v4 = vld [vmem:[#allocation3 + $0x70] sm:$0xff]  ;;  %v68_v5 = vld [vmem:[#allocation3 + $0xe8] sm:$0xff] }
   0xf   :  { %294 = vmatprep.mubr.msk.f32.mxu0 %vm365_vm0, %v364_v0  ;;  %329 = vmatprep.mubr.msk.f32.mxu1 %vm365_vm0, %v364_v0  ;;  %v52_v6 = vld [vmem:[#allocation3 + $0x68] sm:$0xff]  ;;  %v67_v7 = vld [vmem:[#allocation3 + $0xe0] sm:$0xff]  ;;  %v66_v9 = vld [vmem:[#allocation3 + $0xd8] sm:$0xff] }
  0x10   :  { %263 = vmatpush3.msra.mxu0 %v70_v1  ;;  %298 = vmatpush3.msra.mxu1 %v54_v2  ;;  %v51_v8 = vld [vmem:[#allocation3 + $0x60] sm:$0xff]  ;;  %v50_v10 = vld [vmem:[#allocation3 + $0x58] sm:$0xff]  ;;  %v65_v11 = vld [vmem:[#allocation3 + $0xd0] sm:$0xff] }
  0x11   :  { %264 = vmatprep.subr.mxu0 %v364_v0  ;;  %299 = vmatprep.subr.mxu1 %v364_v0  ;;  %v49_v12 = vld [vmem:[#allocation3 + $0x50] sm:$0xff]  ;;  %v64_v13 = vld [vmem:[#allocation3 + $0xc8] sm:$0xff]  ;;  %v63_v15 = vld [vmem:[#allocation3 + $0xc0] sm:$0xff] }
  0x12   :  { %265 = vmatpush3.msra.mxu0 %v69_v3  ;;  %300 = vmatpush3.msra.mxu1 %v53_v4  ;;  %v48_v14 = vld [vmem:[#allocation3 + $0x48] sm:$0xff]  ;;  %v47_v16 = vld [vmem:[#allocation3 + $0x40] sm:$0xff]  ;;  %v62_v17 = vld [vmem:[#allocation3 + $0xb8] sm:$0xff] }
  0x13   :  { %266 = vmatprep.subr.mxu0 %v364_v0  ;;  %301 = vmatprep.subr.mxu1 %v364_v0  ;;  %v46_v18 = vld [vmem:[#allocation3 + $0x38] sm:$0xff]  ;;  %v61_v19 = vld [vmem:[#allocation3 + $0xb0] sm:$0xff]  ;;  %v60_v21 = vld [vmem:[#allocation3 + $0xa8] sm:$0xff] }
  0x14   :  { %267 = vmatpush3.msra.mxu0 %v68_v5  ;;  %302 = vmatpush3.msra.mxu1 %v52_v6  ;;  %v45_v20 = vld [vmem:[#allocation3 + $0x30] sm:$0xff]  ;;  %v44_v22 = vld [vmem:[#allocation3 + $0x28] sm:$0xff]  ;;  %v59_v23 = vld [vmem:[#allocation3 + $0xa0] sm:$0xff] }
  0x15   :  { %268 = vmatprep.subr.mxu0 %v364_v0  ;;  %303 = vmatprep.subr.mxu1 %v364_v0  ;;  %v43_v24 = vld [vmem:[#allocation3 + $0x20] sm:$0xff]  ;;  %v58_v25 = vld [vmem:[#allocation3 + $0x98] sm:$0xff]  ;;  %v57_v27 = vld [vmem:[#allocation3 + $0x90] sm:$0xff] }
  0x16   :  { %269 = vmatpush3.msra.mxu0 %v67_v7  ;;  %304 = vmatpush3.msra.mxu1 %v51_v8  ;;  %v42_v26 = vld [vmem:[#allocation3 + $0x18] sm:$0xff]  ;;  %v41_v28 = vld [vmem:[#allocation3 + $0x10] sm:$0xff]  ;;  %v56_v29 = vld [vmem:[#allocation3 + $0x88] sm:$0xff] }
  0x17   :  { %270 = vmatprep.subr.mxu0 %v364_v0  ;;  %305 = vmatprep.subr.mxu1 %v364_v0  ;;  %v40_v30 = vld [vmem:[#allocation3 + $0x8] sm:$0xff]  ;;  %v55_v31 = vld [vmem:[#allocation3 + $0x80] sm:$0xff] }
  0x18   :  { %271 = vmatpush3.msra.mxu0 %v66_v9  ;;  %306 = vmatpush3.msra.mxu1 %v50_v10  ;;  %v39_v32 = vld [vmem:[#allocation3] sm:$0xff] }
  0x19   :  { %272 = vmatprep.subr.mxu0 %v364_v0  ;;  %307 = vmatprep.subr.mxu1 %v364_v0  ;;  %v35_v33 = vld [vmem:[%s440_s0] sm:$0xff] }
  0x1a   :  { %273 = vmatpush3.msra.mxu0 %v65_v11  ;;  %308 = vmatpush3.msra.mxu1 %v49_v12  ;;  %v37_v34 = vld [vmem:[%s441_s1] sm:$0xff] }
  0x1b   :  { %274 = vmatprep.subr.mxu0 %v364_v0  ;;  %309 = vmatprep.subr.mxu1 %v364_v0  ;;  %v227_v37 = vld [vmem:[%s443_s3] ss:$0 sm:$0xff] }
  0x1c   :  { %275 = vmatpush3.msra.mxu0 %v64_v13  ;;  %310 = vmatpush3.msra.mxu1 %v48_v14 }
  0x1d   :  { %276 = vmatprep.subr.mxu0 %v364_v0  ;;  %311 = vmatprep.subr.mxu1 %v364_v0 }
  0x1e   :  { %277 = vmatpush3.msra.mxu0 %v63_v15  ;;  %312 = vmatpush3.msra.mxu1 %v47_v16 }
  0x1f   :  { %278 = vmatprep.subr.mxu0 %v364_v0  ;;  %313 = vmatprep.subr.mxu1 %v364_v0 }
  0x20   :  { %279 = vmatpush3.msra.mxu0 %v62_v17  ;;  %314 = vmatpush3.msra.mxu1 %v46_v18 }
  0x21   :  { %280 = vmatprep.subr.mxu0 %v364_v0  ;;  %315 = vmatprep.subr.mxu1 %v364_v0 }
  0x22   :  { %281 = vmatpush3.msra.mxu0 %v61_v19  ;;  %316 = vmatpush3.msra.mxu1 %v45_v20 }
  0x23   :  { %282 = vmatprep.subr.mxu0 %v364_v0  ;;  %317 = vmatprep.subr.mxu1 %v364_v0 }
  0x24   :  { %283 = vmatpush3.msra.mxu0 %v60_v21  ;;  %318 = vmatpush3.msra.mxu1 %v44_v22 }
  0x25   :  { %284 = vmatprep.subr.mxu0 %v364_v0  ;;  %319 = vmatprep.subr.mxu1 %v364_v0 }
  0x26   :  { %285 = vmatpush3.msra.mxu0 %v59_v23  ;;  %320 = vmatpush3.msra.mxu1 %v43_v24 }
  0x27   :  { %286 = vmatprep.subr.mxu0 %v364_v0  ;;  %321 = vmatprep.subr.mxu1 %v364_v0 }
  0x28   :  { %287 = vmatpush3.msra.mxu0 %v58_v25  ;;  %322 = vmatpush3.msra.mxu1 %v42_v26 }
  0x29   :  { %288 = vmatprep.subr.mxu0 %v364_v0  ;;  %323 = vmatprep.subr.mxu1 %v364_v0 }
  0x2a   :  { %289 = vmatpush3.msra.mxu0 %v57_v27  ;;  %324 = vmatpush3.msra.mxu1 %v41_v28 }
  0x2b   :  { %290 = vmatprep.subr.mxu0 %v364_v0  ;;  %325 = vmatprep.subr.mxu1 %v364_v0 }
  0x2c   :  { %291 = vmatpush3.msra.mxu0 %v56_v29  ;;  %326 = vmatpush3.msra.mxu1 %v40_v30 }
  0x2d   :  { %292 = vmatprep.subr.mxu0 %v364_v0  ;;  %327 = vmatprep.subr.mxu1 %v364_v0 }
  0x2e   :  { %293 = vmatpush3.msra.mxu0 %v55_v31  ;;  %328 = vmatpush3.msra.mxu1 %v39_v32 }
  0x2f   :  { %295 = vmatmul.mubr.f32.vlgmr.msra.gmra.mxu0 %v35_v33  ;;  %330 = vmatmul.mubr.f32.vlgmr.msra.gmra.mxu1 %v37_v34 }
  0xef   :  { %v137_v35 = vpop.f32.mrf.mxu0  ;;  %v207_v36 = vpop.f32.mrf.mxu1 }
  0xf0   :  { %v208_v38 = vadd.f32 %v207_v36, %v137_v35 }
  0xf1   :  { %v296_v39 = vpop.f32.mrf.mxu0  ;;  %v331_v40 = vpop.f32.mrf.mxu1 }
  0xf2   :  { %v218_v41 = vadd.f32 %v227_v37, %v208_v38 }
  0xf4   :  { %337 = vtanh.f32 %v218_v41 }
 0x101   :  { %v338_v42 = vpop.eup %337 }
 0x102   :  { %221 = vst [vmem:[%s444_s4] sm:$0xff] %v338_v42 }
 0x103   :  { %226 = vsyncpa [#allocation4], 1 }

</bundles_post_ra>
